<compile_context>
chip_gen: v6e
topology: v6e:2x2x1
jax: 0.10.0
libtpu: 0.0.40
codegen_flags: <defaults>
</compile_context>

<pallas_src>
import functools

import numpy as np
import jax
import jax.numpy as jnp
from jax.experimental import pallas as pl
from jax.experimental.pallas import tpu as pltpu


# ----------------------------------------------------------------------------
# Fused kernel: conv1 -> ReLU -> pool -> conv2 -> ReLU -> pool -> L1 partials
# ----------------------------------------------------------------------------

def _vgg_mult_l1_kernel(x_ref, w1_ref, b1_ref, w2_ref, b2_ref,
                        vgg_ref, lab_ref,
                        xpad_s, h1pad_s, accv_s, accl_s,
                        *, H, W, C1, C2):
    H1, W1 = H // 2, W // 2

    @pl.when(pl.program_id(0) == 0)
    def _():
        accv_s[...] = jnp.zeros_like(accv_s)
        accl_s[...] = jnp.zeros_like(accl_s)

    xf = x_ref[0]                                    # (2, H, W*Cin) f32

    # ---- pixel-space (lab) L1 partial: sum |input - target| ----------------
    accl_s[...] += jnp.abs(xf[0] - xf[1])

    # ---- zero-pad rows (H-direction SAME padding) into VMEM scratch --------
    xpad_s[...] = jnp.zeros_like(xpad_s)
    xpad_s[:, 1:1 + H, :] = xf

    def conv_relu_pool(pad_ref, w_ref, b_ref, rows, n_lanes):
        # pad_ref: (2, rows+2, K) f32 ; w_ref: (3, K, n_lanes) bf16 ;
        # b_ref: (1, n_lanes) f32.  Returns (2, rows//2, n_lanes//2) f32.
        acc = None
        for dh in range(3):                          # 3 banded MXU matmuls
            op = pad_ref[:, dh:dh + rows, :].reshape(2 * rows, -1)
            d = jnp.dot(op.astype(jnp.bfloat16), w_ref[dh],
                        preferred_element_type=jnp.float32)
            acc = d if acc is None else acc + d
        y = jnp.maximum(acc + b_ref[...], 0.0)       # (2*rows, n_lanes) f32
        # H-half of the 2x2 max-pool: adjacent row pairs (leading-dim select).
        y4 = y.reshape(rows, 2, 1, n_lanes)
        yh = jnp.maximum(y4[:, 0], y4[:, 1])         # (rows, 1, n_lanes)
        yh = yh.reshape(2, rows // 2, n_lanes)
        # W-half: the lowered weights put even-w columns in the first lane half
        # and odd-w columns in the second, so pooling is a contiguous halves
        # max and directly yields the compact (w, c) lane layout layer 2 wants.
        half = n_lanes // 2
        return jnp.maximum(yh[..., :half], yh[..., half:])

    h1 = conv_relu_pool(xpad_s, w1_ref, b1_ref, H, W * C1)       # (2,H1,W1*C1)

    h1pad_s[...] = jnp.zeros_like(h1pad_s)
    h1pad_s[:, 1:1 + H1, :] = h1

    feat = conv_relu_pool(h1pad_s, w2_ref, b2_ref, H1, W1 * C2)  # (2,H2,W2*C2)

    # ---- VGG-feature L1 partial: sum |feat(input) - feat(target)| ----------
    accv_s[...] += jnp.abs(feat[0] - feat[1])

    @pl.when(pl.program_id(0) == pl.num_programs(0) - 1)
    def _():
        vgg_ref[...] = jnp.zeros((1, 1), jnp.float32) + jnp.sum(accv_s[...])
        lab_ref[...] = jnp.zeros((1, 1), jnp.float32) + jnp.sum(accl_s[...])


# ----------------------------------------------------------------------------
# Small deterministic "VGG" feature extractor params + weight lowering
# ----------------------------------------------------------------------------

def init_vgg_params(cin=3, c1=8, c2=16, seed=0):
    k = jax.random.PRNGKey(seed)
    k1, k2, k3, k4 = jax.random.split(k, 4)
    return {
        "w1": jax.random.normal(k1, (c1, cin, 3, 3), jnp.float32) * 0.1,
        "b1": jax.random.normal(k2, (c1,), jnp.float32) * 0.01,
        "w2": jax.random.normal(k3, (c2, c1, 3, 3), jnp.float32) * 0.1,
        "b2": jax.random.normal(k4, (c2,), jnp.float32) * 0.01,
    }


def _lower_conv3x3(w_oihw, w_out):
    """OIHW 3x3 weights -> banded (3, w_out*Cin, w_out*Cout) bf16 matrices.

    y[h, col(wo)*Cout + co] = sum_dh xrow[h+dh] @ mats[dh], with output
    columns permuted even-w-first / odd-w-second so the following 2x2 pool's
    W-half is a contiguous lane-halves max.  W-direction SAME zero padding is
    realized by omitting out-of-range rows.
    """
    w = np.asarray(w_oihw, np.float32)               # (Cout, Cin, 3, 3)
    cout, cin = w.shape[0], w.shape[1]
    mats = np.zeros((3, w_out * cin, w_out * cout), np.float32)
    for wo in range(w_out):
        col = wo // 2 if wo % 2 == 0 else w_out // 2 + wo // 2
        for dw in range(3):
            wi = wo + dw - 1
            if 0 <= wi < w_out:
                for dh in range(3):
                    mats[dh, wi * cin:(wi + 1) * cin,
                         col * cout:(col + 1) * cout] = w[:, :, dh, dw].T
    return jnp.asarray(mats, jnp.bfloat16)


def prepare_loss_params(params, H, W):
    """Pre-lower conv weights for a fixed input spatial size (outside jit)."""
    assert H % 4 == 0 and W % 4 == 0, "two 2x2 max-pools need H, W % 4 == 0"
    c1 = params["w1"].shape[0]
    c2 = params["w2"].shape[0]
    return {
        "w1m": _lower_conv3x3(params["w1"], W),
        "b1r": jnp.tile(params["b1"].astype(jnp.float32), W).reshape(1, W * c1),
        "w2m": _lower_conv3x3(params["w2"], W // 2),
        "b2r": jnp.tile(params["b2"].astype(jnp.float32),
                        W // 2).reshape(1, (W // 2) * c2),
    }


# ----------------------------------------------------------------------------
# VGGmultL1_Loss forward
# ----------------------------------------------------------------------------

@jax.jit
def vgg_mult_l1_loss(prep, x_input, x_target):
    """x_input / x_target: (N, C, H, W) NCHW, matching the PyTorch module."""
    N, C, H, W = x_input.shape
    H1, W1 = H // 2, W // 2
    H2, W2 = H1 // 2, W1 // 2
    C1 = prep["w1m"].shape[-1] // W
    C2 = prep["w2m"].shape[-1] // W1
    assert prep["w1m"].shape[1] == W * C, "prep/input spatial size mismatch"

    # One relayout: NCHW -> rows (h) x lanes (w, c), input/target pair-stacked.
    def to_rows(x):
        return jnp.transpose(x, (0, 2, 3, 1)).reshape(N, H, W * C)
    x_pair = jnp.stack([to_rows(x_input), to_rows(x_target)],
                       axis=1).astype(jnp.float32)            # (N, 2, H, W*C)

    kern = functools.partial(_vgg_mult_l1_kernel, H=H, W=W, C1=C1, C2=C2)
    cost = pl.CostEstimate(
        flops=2 * N * 3 * ((2 * H) * (W * C) * (W * C1)
                           + (2 * H1) * (W1 * C1) * (W1 * C2)),
        transcendentals=0,
        bytes_accessed=(x_pair.size * 4 + prep["w1m"].size * 2
                        + prep["w2m"].size * 2 + prep["b1r"].size * 4
                        + prep["b2r"].size * 4 + 8),
    )

    vgg_sum, lab_sum = pl.pallas_call(
        kern,
        out_shape=(jax.ShapeDtypeStruct((1, 1), jnp.float32),
                   jax.ShapeDtypeStruct((1, 1), jnp.float32)),
        grid=(N,),
        in_specs=[
            pl.BlockSpec((1, 2, H, W * C), lambda b: (b, 0, 0, 0)),
            pl.BlockSpec((3, W * C, W * C1), lambda b: (0, 0, 0)),
            pl.BlockSpec((1, W * C1), lambda b: (0, 0)),
            pl.BlockSpec((3, W1 * C1, W1 * C2), lambda b: (0, 0, 0)),
            pl.BlockSpec((1, W1 * C2), lambda b: (0, 0)),
        ],
        out_specs=(pl.BlockSpec((1, 1), lambda b: (0, 0)),
                   pl.BlockSpec((1, 1), lambda b: (0, 0))),
        scratch_shapes=[
            pltpu.VMEM((2, H + 2, W * C), jnp.float32),     # padded layer-1 in
            pltpu.VMEM((2, H1 + 2, W1 * C1), jnp.float32),  # padded layer-2 in
            pltpu.VMEM((H2, W2 * C2), jnp.float32),         # feature-L1 accum
            pltpu.VMEM((H, W * C), jnp.float32),            # pixel-L1 accum
        ],
        compiler_params=pltpu.CompilerParams(
            dimension_semantics=("arbitrary",)),
        cost_estimate=cost,
    )(x_pair, prep["w1m"], prep["b1r"], prep["w2m"], prep["b2r"])

    vgg_loss = vgg_sum[0, 0] / (N * H2 * W2 * C2)
    lab_loss = lab_sum[0, 0] / (N * C * H * W)
    return vgg_loss * lab_loss * 10.0


if __name__ == "__main__":
    key = jax.random.PRNGKey(0)
    k_in, k_tgt = jax.random.split(key)

    N, C, H, W = 2, 3, 16, 16
    x_input = jax.random.normal(k_in, (N, C, H, W), jnp.float32)
    x_target = jax.random.normal(k_tgt, (N, C, H, W), jnp.float32)

    params = init_vgg_params(cin=C, c1=8, c2=16, seed=0)
    prep = prepare_loss_params(params, H, W)

    loss = vgg_mult_l1_loss(prep, x_input, x_target)
    jax.block_until_ready(loss)

    # Pure-JAX reference with identical bf16 operand quantization.
    def pool2(y):
        n_, h_, w_, c_ = y.shape
        return y.reshape(n_, h_ // 2, 2, w_ // 2, 2, c_).max(axis=(2, 4))

    def ref_feats(p, x_nchw):
        x = jnp.transpose(x_nchw, (0, 2, 3, 1))
        xq = x.astype(jnp.bfloat16).astype(jnp.float32)
        w1q = p["w1"].astype(jnp.bfloat16).astype(jnp.float32)
        y = jax.lax.conv_general_dilated(
            xq, w1q, (1, 1), "SAME",
            dimension_numbers=("NHWC", "OIHW", "NHWC"))
        y = pool2(jnp.maximum(y + p["b1"][None, None, None, :], 0.0))
        yq = y.astype(jnp.bfloat16).astype(jnp.float32)
        w2q = p["w2"].astype(jnp.bfloat16).astype(jnp.float32)
        y = jax.lax.conv_general_dilated(
            yq, w2q, (1, 1), "SAME",
            dimension_numbers=("NHWC", "OIHW", "NHWC"))
        return pool2(jnp.maximum(y + p["b2"][None, None, None, :], 0.0))

    fi = ref_feats(params, x_input)
    ft = ref_feats(params, x_target)
    ref = (jnp.mean(jnp.abs(fi - ft))
           * jnp.mean(jnp.abs(x_input - x_target)) * 10.0)
    assert jnp.allclose(loss, ref, rtol=2e-3, atol=1e-6), (loss, ref)

    print("KERNEL_OK")
</pallas_src>

<mosaic_0001>
module attributes {stable_mosaic.version = 11 : i64} {
  func.func @_vgg_mult_l1_kernel(%arg0: i32, %arg1: memref<1x2x16x48xf32, #tpu.memory_space<vmem>>, %arg2: memref<3x48x128xbf16, #tpu.memory_space<vmem>>, %arg3: memref<1x128xf32, #tpu.memory_space<vmem>>, %arg4: memref<3x64x128xbf16, #tpu.memory_space<vmem>>, %arg5: memref<1x128xf32, #tpu.memory_space<vmem>>, %arg6: memref<1x1xf32, #tpu.memory_space<vmem>>, %arg7: memref<1x1xf32, #tpu.memory_space<vmem>>, %arg8: memref<2x18x48xf32, #tpu.memory_space<vmem>>, %arg9: memref<2x10x64xf32, #tpu.memory_space<vmem>>, %arg10: memref<4x64xf32, #tpu.memory_space<vmem>>, %arg11: memref<16x48xf32, #tpu.memory_space<vmem>>) attributes {dimension_semantics = [#tpu.dimension_semantics<arbitrary>], iteration_bounds = array<i64: 2>, scalar_prefetch = 0 : i64, scratch_operands = 4 : i64, tpu.core_type = #tpu.core_type<tc>, window_params = [{transform_indices = @transform_0, window_bounds = array<i64: 1, 2, 16, 48>}, {pipeline_mode = #tpu.pipeline_mode<synchronous>, transform_indices = @transform_1, window_bounds = array<i64: 3, 48, 128>}, {pipeline_mode = #tpu.pipeline_mode<synchronous>, transform_indices = @transform_2, window_bounds = array<i64: 1, 128>}, {pipeline_mode = #tpu.pipeline_mode<synchronous>, transform_indices = @transform_3, window_bounds = array<i64: 3, 64, 128>}, {pipeline_mode = #tpu.pipeline_mode<synchronous>, transform_indices = @transform_4, window_bounds = array<i64: 1, 128>}, {pipeline_mode = #tpu.pipeline_mode<synchronous>, transform_indices = @transform_5, window_bounds = array<i64: 1, 1>}, {pipeline_mode = #tpu.pipeline_mode<synchronous>, transform_indices = @transform_6, window_bounds = array<i64: 1, 1>}]} {
    %c0_i32 = arith.constant 0 : i32
    %0 = arith.cmpi eq, %arg0, %c0_i32 : i32
    %1 = arith.extui %0 : i1 to i32
    %c0_i32_0 = arith.constant 0 : i32
    %2 = arith.cmpi ne, %1, %c0_i32_0 : i32
    scf.if %2 {
      %cst_72 = arith.constant 0.000000e+00 : f32
      %102 = vector.broadcast %cst_72 : f32 to vector<4x64xf32>
      %c0_73 = arith.constant 0 : index
      %c0_74 = arith.constant 0 : index
      %103 = vector.load %arg10[%c0_73, %c0_74] : memref<4x64xf32, #tpu.memory_space<vmem>>, vector<4x64xf32>
      tpu.vector_store %arg10[%c0_73, %c0_74], %102 {strides = array<i32>} : memref<4x64xf32, #tpu.memory_space<vmem>>, vector<4x64xf32>,
      %cst_75 = arith.constant 0.000000e+00 : f32
      %104 = vector.broadcast %cst_75 : f32 to vector<16x48xf32>
      %c0_76 = arith.constant 0 : index
      %c0_77 = arith.constant 0 : index
      %105 = vector.load %arg11[%c0_76, %c0_77] : memref<16x48xf32, #tpu.memory_space<vmem>>, vector<16x48xf32>
      tpu.vector_store %arg11[%c0_76, %c0_77], %104 {strides = array<i32>} : memref<16x48xf32, #tpu.memory_space<vmem>>, vector<16x48xf32>,
    } else {
    }
    %c0 = arith.constant 0 : index
    %c0_1 = arith.constant 0 : index
    %c0_2 = arith.constant 0 : index
    %c0_3 = arith.constant 0 : index
    %3 = vector.load %arg1[%c0, %c0_1, %c0_2, %c0_3] : memref<1x2x16x48xf32, #tpu.memory_space<vmem>>, vector<1x2x16x48xf32>
    %4 = vector.shape_cast %3 : vector<1x2x16x48xf32> to vector<2x16x48xf32>
    %c0_4 = arith.constant 0 : index
    %c0_5 = arith.constant 0 : index
    %5 = vector.load %arg11[%c0_4, %c0_5] : memref<16x48xf32, #tpu.memory_space<vmem>>, vector<16x48xf32>
    %6 = vector.extract_strided_slice %4 {offsets = [0, 0, 0], sizes = [1, 16, 48], strides = [1, 1, 1]} : vector<2x16x48xf32> to vector<1x16x48xf32>
    %7 = vector.shape_cast %6 : vector<1x16x48xf32> to vector<16x48xf32>
    %8 = vector.extract_strided_slice %4 {offsets = [1, 0, 0], sizes = [1, 16, 48], strides = [1, 1, 1]} : vector<2x16x48xf32> to vector<1x16x48xf32>
    %9 = vector.shape_cast %8 : vector<1x16x48xf32> to vector<16x48xf32>
    %10 = arith.subf %7, %9 : vector<16x48xf32>
    %11 = math.absf %10 : vector<16x48xf32>
    %12 = arith.addf %5, %11 : vector<16x48xf32>
    %c0_6 = arith.constant 0 : index
    %c0_7 = arith.constant 0 : index
    %13 = vector.load %arg11[%c0_6, %c0_7] : memref<16x48xf32, #tpu.memory_space<vmem>>, vector<16x48xf32>
    tpu.vector_store %arg11[%c0_6, %c0_7], %12 {strides = array<i32>} : memref<16x48xf32, #tpu.memory_space<vmem>>, vector<16x48xf32>,
    %cst = arith.constant 0.000000e+00 : f32
    %14 = vector.broadcast %cst : f32 to vector<2x18x48xf32>
    %c0_8 = arith.constant 0 : index
    %c0_9 = arith.constant 0 : index
    %c0_10 = arith.constant 0 : index
    %15 = vector.load %arg8[%c0_8, %c0_9, %c0_10] : memref<2x18x48xf32, #tpu.memory_space<vmem>>, vector<2x18x48xf32>
    tpu.vector_store %arg8[%c0_8, %c0_9, %c0_10], %14 {strides = array<i32>} : memref<2x18x48xf32, #tpu.memory_space<vmem>>, vector<2x18x48xf32>,
    %c0_11 = arith.constant 0 : index
    %c1 = arith.constant 1 : index
    %c0_12 = arith.constant 0 : index
    %16 = vector.load %arg8[%c0_11, %c1, %c0_12] : memref<2x18x48xf32, #tpu.memory_space<vmem>>, vector<2x16x48xf32>
    tpu.vector_store %arg8[%c0_11, %c1, %c0_12], %4 {strides = array<i32>} : memref<2x18x48xf32, #tpu.memory_space<vmem>>, vector<2x16x48xf32>,
    %c0_13 = arith.constant 0 : index
    %c0_14 = arith.constant 0 : index
    %c0_15 = arith.constant 0 : index
    %17 = vector.load %arg8[%c0_13, %c0_14, %c0_15] : memref<2x18x48xf32, #tpu.memory_space<vmem>>, vector<2x16x48xf32>
    %18 = vector.shape_cast %17 : vector<2x16x48xf32> to vector<32x48xf32>
    %19 = arith.truncf %18 : vector<32x48xf32> to vector<32x48xbf16>
    %c0_16 = arith.constant 0 : index
    %c0_17 = arith.constant 0 : index
    %c0_18 = arith.constant 0 : index
    %20 = vector.load %arg2[%c0_16, %c0_17, %c0_18] : memref<3x48x128xbf16, #tpu.memory_space<vmem>>, vector<1x48x128xbf16>
    %21 = vector.shape_cast %20 : vector<1x48x128xbf16> to vector<48x128xbf16>
    %cst_19 = arith.constant dense<0.000000e+00> : vector<32x128xf32>
    %22 = tpu.matmul %19, %21, %cst_19 {dimension_numbers = #tpu.dot_dimension_numbers<[1], [0], [0], [1], [0, 0, 1, 1], [], []>} : vector<32x48xbf16>, vector<48x128xbf16>, vector<32x128xf32> -> vector<32x128xf32>
    %c0_20 = arith.constant 0 : index
    %c1_21 = arith.constant 1 : index
    %c0_22 = arith.constant 0 : index
    %23 = vector.load %arg8[%c0_20, %c1_21, %c0_22] : memref<2x18x48xf32, #tpu.memory_space<vmem>>, vector<2x16x48xf32>
    %24 = vector.shape_cast %23 : vector<2x16x48xf32> to vector<32x48xf32>
    %25 = arith.truncf %24 : vector<32x48xf32> to vector<32x48xbf16>
    %c1_23 = arith.constant 1 : index
    %c0_24 = arith.constant 0 : index
    %c0_25 = arith.constant 0 : index
    %26 = vector.load %arg2[%c1_23, %c0_24, %c0_25] : memref<3x48x128xbf16, #tpu.memory_space<vmem>>, vector<1x48x128xbf16>
    %27 = vector.shape_cast %26 : vector<1x48x128xbf16> to vector<48x128xbf16>
    %cst_26 = arith.constant dense<0.000000e+00> : vector<32x128xf32>
    %28 = tpu.matmul %25, %27, %cst_26 {dimension_numbers = #tpu.dot_dimension_numbers<[1], [0], [0], [1], [0, 0, 1, 1], [], []>} : vector<32x48xbf16>, vector<48x128xbf16>, vector<32x128xf32> -> vector<32x128xf32>
    %29 = arith.addf %22, %28 : vector<32x128xf32>
    %c0_27 = arith.constant 0 : index
    %c2 = arith.constant 2 : index
    %c0_28 = arith.constant 0 : index
    %30 = vector.load %arg8[%c0_27, %c2, %c0_28] : memref<2x18x48xf32, #tpu.memory_space<vmem>>, vector<2x16x48xf32>
    %31 = vector.shape_cast %30 : vector<2x16x48xf32> to vector<32x48xf32>
    %32 = arith.truncf %31 : vector<32x48xf32> to vector<32x48xbf16>
    %c2_29 = arith.constant 2 : index
    %c0_30 = arith.constant 0 : index
    %c0_31 = arith.constant 0 : index
    %33 = vector.load %arg2[%c2_29, %c0_30, %c0_31] : memref<3x48x128xbf16, #tpu.memory_space<vmem>>, vector<1x48x128xbf16>
    %34 = vector.shape_cast %33 : vector<1x48x128xbf16> to vector<48x128xbf16>
    %cst_32 = arith.constant dense<0.000000e+00> : vector<32x128xf32>
    %35 = tpu.matmul %32, %34, %cst_32 {dimension_numbers = #tpu.dot_dimension_numbers<[1], [0], [0], [1], [0, 0, 1, 1], [], []>} : vector<32x48xbf16>, vector<48x128xbf16>, vector<32x128xf32> -> vector<32x128xf32>
    %36 = arith.addf %29, %35 : vector<32x128xf32>
    %c0_33 = arith.constant 0 : index
    %c0_34 = arith.constant 0 : index
    %37 = vector.load %arg3[%c0_33, %c0_34] : memref<1x128xf32, #tpu.memory_space<vmem>>, vector<1x128xf32>
    %38 = vector.broadcast %37 : vector<1x128xf32> to vector<32x128xf32>
    %39 = arith.addf %36, %38 : vector<32x128xf32>
    %cst_35 = arith.constant 0.000000e+00 : f32
    %40 = vector.broadcast %cst_35 : f32 to vector<32x128xf32>
    %41 = arith.maximumf %39, %40 : vector<32x128xf32>
    %42 = vector.shape_cast %41 : vector<32x128xf32> to vector<16x2x1x128xf32>
    %43 = vector.extract_strided_slice %42 {offsets = [0, 0, 0, 0], sizes = [16, 1, 1, 128], strides = [1, 1, 1, 1]} : vector<16x2x1x128xf32> to vector<16x1x1x128xf32>
    %44 = vector.shape_cast %43 : vector<16x1x1x128xf32> to vector<16x1x128xf32>
    %45 = vector.extract_strided_slice %42 {offsets = [0, 1, 0, 0], sizes = [16, 1, 1, 128], strides = [1, 1, 1, 1]} : vector<16x2x1x128xf32> to vector<16x1x1x128xf32>
    %46 = vector.shape_cast %45 : vector<16x1x1x128xf32> to vector<16x1x128xf32>
    %47 = arith.maximumf %44, %46 : vector<16x1x128xf32>
    %48 = vector.shape_cast %47 : vector<16x1x128xf32> to vector<2x8x128xf32>
    %49 = vector.extract_strided_slice %48 {offsets = [0, 0, 0], sizes = [2, 8, 64], strides = [1, 1, 1]} : vector<2x8x128xf32> to vector<2x8x64xf32>
    %50 = vector.extract_strided_slice %48 {offsets = [0, 0, 64], sizes = [2, 8, 64], strides = [1, 1, 1]} : vector<2x8x128xf32> to vector<2x8x64xf32>
    %51 = arith.maximumf %49, %50 : vector<2x8x64xf32>
    %cst_36 = arith.constant 0.000000e+00 : f32
    %52 = vector.broadcast %cst_36 : f32 to vector<2x10x64xf32>
    %c0_37 = arith.constant 0 : index
    %c0_38 = arith.constant 0 : index
    %c0_39 = arith.constant 0 : index
    %53 = vector.load %arg9[%c0_37, %c0_38, %c0_39] : memref<2x10x64xf32, #tpu.memory_space<vmem>>, vector<2x10x64xf32>
    tpu.vector_store %arg9[%c0_37, %c0_38, %c0_39], %52 {strides = array<i32>} : memref<2x10x64xf32, #tpu.memory_space<vmem>>, vector<2x10x64xf32>,
    %c0_40 = arith.constant 0 : index
    %c1_41 = arith.constant 1 : index
    %c0_42 = arith.constant 0 : index
    %54 = vector.load %arg9[%c0_40, %c1_41, %c0_42] : memref<2x10x64xf32, #tpu.memory_space<vmem>>, vector<2x8x64xf32>
    tpu.vector_store %arg9[%c0_40, %c1_41, %c0_42], %51 {strides = array<i32>} : memref<2x10x64xf32, #tpu.memory_space<vmem>>, vector<2x8x64xf32>,
    %c0_43 = arith.constant 0 : index
    %c0_44 = arith.constant 0 : index
    %c0_45 = arith.constant 0 : index
    %55 = vector.load %arg9[%c0_43, %c0_44, %c0_45] : memref<2x10x64xf32, #tpu.memory_space<vmem>>, vector<2x8x64xf32>
    %56 = vector.shape_cast %55 : vector<2x8x64xf32> to vector<16x64xf32>
    %57 = arith.truncf %56 : vector<16x64xf32> to vector<16x64xbf16>
    %c0_46 = arith.constant 0 : index
    %c0_47 = arith.constant 0 : index
    %c0_48 = arith.constant 0 : index
    %58 = vector.load %arg4[%c0_46, %c0_47, %c0_48] : memref<3x64x128xbf16, #tpu.memory_space<vmem>>, vector<1x64x128xbf16>
    %59 = vector.shape_cast %58 : vector<1x64x128xbf16> to vector<64x128xbf16>
    %cst_49 = arith.constant dense<0.000000e+00> : vector<16x128xf32>
    %60 = tpu.matmul %57, %59, %cst_49 {dimension_numbers = #tpu.dot_dimension_numbers<[1], [0], [0], [1], [0, 0, 1, 1], [], []>} : vector<16x64xbf16>, vector<64x128xbf16>, vector<16x128xf32> -> vector<16x128xf32>
    %c0_50 = arith.constant 0 : index
    %c1_51 = arith.constant 1 : index
    %c0_52 = arith.constant 0 : index
    %61 = vector.load %arg9[%c0_50, %c1_51, %c0_52] : memref<2x10x64xf32, #tpu.memory_space<vmem>>, vector<2x8x64xf32>
    %62 = vector.shape_cast %61 : vector<2x8x64xf32> to vector<16x64xf32>
    %63 = arith.truncf %62 : vector<16x64xf32> to vector<16x64xbf16>
    %c1_53 = arith.constant 1 : index
    %c0_54 = arith.constant 0 : index
    %c0_55 = arith.constant 0 : index
    %64 = vector.load %arg4[%c1_53, %c0_54, %c0_55] : memref<3x64x128xbf16, #tpu.memory_space<vmem>>, vector<1x64x128xbf16>
    %65 = vector.shape_cast %64 : vector<1x64x128xbf16> to vector<64x128xbf16>
    %cst_56 = arith.constant dense<0.000000e+00> : vector<16x128xf32>
    %66 = tpu.matmul %63, %65, %cst_56 {dimension_numbers = #tpu.dot_dimension_numbers<[1], [0], [0], [1], [0, 0, 1, 1], [], []>} : vector<16x64xbf16>, vector<64x128xbf16>, vector<16x128xf32> -> vector<16x128xf32>
    %67 = arith.addf %60, %66 : vector<16x128xf32>
    %c0_57 = arith.constant 0 : index
    %c2_58 = arith.constant 2 : index
    %c0_59 = arith.constant 0 : index
    %68 = vector.load %arg9[%c0_57, %c2_58, %c0_59] : memref<2x10x64xf32, #tpu.memory_space<vmem>>, vector<2x8x64xf32>
    %69 = vector.shape_cast %68 : vector<2x8x64xf32> to vector<16x64xf32>
    %70 = arith.truncf %69 : vector<16x64xf32> to vector<16x64xbf16>
    %c2_60 = arith.constant 2 : index
    %c0_61 = arith.constant 0 : index
    %c0_62 = arith.constant 0 : index
    %71 = vector.load %arg4[%c2_60, %c0_61, %c0_62] : memref<3x64x128xbf16, #tpu.memory_space<vmem>>, vector<1x64x128xbf16>
    %72 = vector.shape_cast %71 : vector<1x64x128xbf16> to vector<64x128xbf16>
    %cst_63 = arith.constant dense<0.000000e+00> : vector<16x128xf32>
    %73 = tpu.matmul %70, %72, %cst_63 {dimension_numbers = #tpu.dot_dimension_numbers<[1], [0], [0], [1], [0, 0, 1, 1], [], []>} : vector<16x64xbf16>, vector<64x128xbf16>, vector<16x128xf32> -> vector<16x128xf32>
    %74 = arith.addf %67, %73 : vector<16x128xf32>
    %c0_64 = arith.constant 0 : index
    %c0_65 = arith.constant 0 : index
    %75 = vector.load %arg5[%c0_64, %c0_65] : memref<1x128xf32, #tpu.memory_space<vmem>>, vector<1x128xf32>
    %76 = vector.broadcast %75 : vector<1x128xf32> to vector<16x128xf32>
    %77 = arith.addf %74, %76 : vector<16x128xf32>
    %cst_66 = arith.constant 0.000000e+00 : f32
    %78 = vector.broadcast %cst_66 : f32 to vector<16x128xf32>
    %79 = arith.maximumf %77, %78 : vector<16x128xf32>
    %80 = vector.shape_cast %79 : vector<16x128xf32> to vector<8x2x1x128xf32>
    %81 = vector.extract_strided_slice %80 {offsets = [0, 0, 0, 0], sizes = [8, 1, 1, 128], strides = [1, 1, 1, 1]} : vector<8x2x1x128xf32> to vector<8x1x1x128xf32>
    %82 = vector.shape_cast %81 : vector<8x1x1x128xf32> to vector<8x1x128xf32>
    %83 = vector.extract_strided_slice %80 {offsets = [0, 1, 0, 0], sizes = [8, 1, 1, 128], strides = [1, 1, 1, 1]} : vector<8x2x1x128xf32> to vector<8x1x1x128xf32>
    %84 = vector.shape_cast %83 : vector<8x1x1x128xf32> to vector<8x1x128xf32>
    %85 = arith.maximumf %82, %84 : vector<8x1x128xf32>
    %86 = vector.shape_cast %85 : vector<8x1x128xf32> to vector<2x4x128xf32>
    %87 = vector.extract_strided_slice %86 {offsets = [0, 0, 0], sizes = [2, 4, 64], strides = [1, 1, 1]} : vector<2x4x128xf32> to vector<2x4x64xf32>
    %88 = vector.extract_strided_slice %86 {offsets = [0, 0, 64], sizes = [2, 4, 64], strides = [1, 1, 1]} : vector<2x4x128xf32> to vector<2x4x64xf32>
    %89 = arith.maximumf %87, %88 : vector<2x4x64xf32>
    %c0_67 = arith.constant 0 : index
    %c0_68 = arith.constant 0 : index
    %90 = vector.load %arg10[%c0_67, %c0_68] : memref<4x64xf32, #tpu.memory_space<vmem>>, vector<4x64xf32>
    %91 = vector.extract_strided_slice %89 {offsets = [0, 0, 0], sizes = [1, 4, 64], strides = [1, 1, 1]} : vector<2x4x64xf32> to vector<1x4x64xf32>
    %92 = vector.shape_cast %91 : vector<1x4x64xf32> to vector<4x64xf32>
    %93 = vector.extract_strided_slice %89 {offsets = [1, 0, 0], sizes = [1, 4, 64], strides = [1, 1, 1]} : vector<2x4x64xf32> to vector<1x4x64xf32>
    %94 = vector.shape_cast %93 : vector<1x4x64xf32> to vector<4x64xf32>
    %95 = arith.subf %92, %94 : vector<4x64xf32>
    %96 = math.absf %95 : vector<4x64xf32>
    %97 = arith.addf %90, %96 : vector<4x64xf32>
    %c0_69 = arith.constant 0 : index
    %c0_70 = arith.constant 0 : index
    %98 = vector.load %arg10[%c0_69, %c0_70] : memref<4x64xf32, #tpu.memory_space<vmem>>, vector<4x64xf32>
    tpu.vector_store %arg10[%c0_69, %c0_70], %97 {strides = array<i32>} : memref<4x64xf32, #tpu.memory_space<vmem>>, vector<4x64xf32>,
    %c1_i32 = arith.constant 1 : i32
    %99 = arith.cmpi eq, %arg0, %c1_i32 : i32
    %100 = arith.extui %99 : i1 to i32
    %c0_i32_71 = arith.constant 0 : i32
    %101 = arith.cmpi ne, %100, %c0_i32_71 : i32
    scf.if %101 {
      %cst_72 = arith.constant 0.000000e+00 : f32
      %102 = vector.broadcast %cst_72 : f32 to vector<1x1xf32>
      %c0_73 = arith.constant 0 : index
      %c0_74 = arith.constant 0 : index
      %103 = vector.load %arg10[%c0_73, %c0_74] : memref<4x64xf32, #tpu.memory_space<vmem>>, vector<4x64xf32>
      %104 = vector.shape_cast %103 : vector<4x64xf32> to vector<1x4x64xf32>
      %cst_75 = arith.constant dense<0.000000e+00> : vector<1xf32>
      %105 = vector.multi_reduction <add>, %104, %cst_75 [1, 2] : vector<1x4x64xf32> to vector<1xf32>
      %106 = vector.shape_cast %105 : vector<1xf32> to vector<1x1x1xf32>
      %107 = vector.extract %106[0, 0, 0] : f32 from vector<1x1x1xf32>
      %108 = vector.broadcast %107 : f32 to vector<1x1xf32>
      %109 = arith.addf %102, %108 : vector<1x1xf32>
      %c0_76 = arith.constant 0 : index
      %c0_77 = arith.constant 0 : index
      %110 = vector.load %arg6[%c0_76, %c0_77] : memref<1x1xf32, #tpu.memory_space<vmem>>, vector<1x1xf32>
      tpu.vector_store %arg6[%c0_76, %c0_77], %109 {strides = array<i32>} : memref<1x1xf32, #tpu.memory_space<vmem>>, vector<1x1xf32>,
      %cst_78 = arith.constant 0.000000e+00 : f32
      %111 = vector.broadcast %cst_78 : f32 to vector<1x1xf32>
      %c0_79 = arith.constant 0 : index
      %c0_80 = arith.constant 0 : index
      %112 = vector.load %arg11[%c0_79, %c0_80] : memref<16x48xf32, #tpu.memory_space<vmem>>, vector<16x48xf32>
      %113 = vector.shape_cast %112 : vector<16x48xf32> to vector<1x16x48xf32>
      %cst_81 = arith.constant dense<0.000000e+00> : vector<1xf32>
      %114 = vector.multi_reduction <add>, %113, %cst_81 [1, 2] : vector<1x16x48xf32> to vector<1xf32>
      %115 = vector.shape_cast %114 : vector<1xf32> to vector<1x1x1xf32>
      %116 = vector.extract %115[0, 0, 0] : f32 from vector<1x1x1xf32>
      %117 = vector.broadcast %116 : f32 to vector<1x1xf32>
      %118 = arith.addf %111, %117 : vector<1x1xf32>
      %c0_82 = arith.constant 0 : index
      %c0_83 = arith.constant 0 : index
      %119 = vector.load %arg7[%c0_82, %c0_83] : memref<1x1xf32, #tpu.memory_space<vmem>>, vector<1x1xf32>
      tpu.vector_store %arg7[%c0_82, %c0_83], %118 {strides = array<i32>} : memref<1x1xf32, #tpu.memory_space<vmem>>, vector<1x1xf32>,
    } else {
    }
    return
  }
  func.func @transform_0(%arg0: i32) -> (i32, i32, i32, i32) {
    %c0_i32 = arith.constant 0 : i32
    %c0_i32_0 = arith.constant 0 : i32
    %c0_i32_1 = arith.constant 0 : i32
    %c0_i32_2 = arith.constant 0 : i32
    return %arg0, %c0_i32, %c0_i32_0, %c0_i32_1 : i32, i32, i32, i32
  }
  func.func @transform_1(%arg0: i32) -> (i32, i32, i32) {
    %c0_i32 = arith.constant 0 : i32
    %c0_i32_0 = arith.constant 0 : i32
    %c0_i32_1 = arith.constant 0 : i32
    %c0_i32_2 = arith.constant 0 : i32
    return %c0_i32, %c0_i32_0, %c0_i32_1 : i32, i32, i32
  }
  func.func @transform_2(%arg0: i32) -> (i32, i32) {
    %c0_i32 = arith.constant 0 : i32
    %c0_i32_0 = arith.constant 0 : i32
    %c0_i32_1 = arith.constant 0 : i32
    return %c0_i32, %c0_i32_0 : i32, i32
  }
  func.func @transform_3(%arg0: i32) -> (i32, i32, i32) {
    %c0_i32 = arith.constant 0 : i32
    %c0_i32_0 = arith.constant 0 : i32
    %c0_i32_1 = arith.constant 0 : i32
    %c0_i32_2 = arith.constant 0 : i32
    return %c0_i32, %c0_i32_0, %c0_i32_1 : i32, i32, i32
  }
  func.func @transform_4(%arg0: i32) -> (i32, i32) {
    %c0_i32 = arith.constant 0 : i32
    %c0_i32_0 = arith.constant 0 : i32
    %c0_i32_1 = arith.constant 0 : i32
    return %c0_i32, %c0_i32_0 : i32, i32
  }
  func.func @transform_5(%arg0: i32) -> (i32, i32) {
    %c0_i32 = arith.constant 0 : i32
    %c0_i32_0 = arith.constant 0 : i32
    %c0_i32_1 = arith.constant 0 : i32
    return %c0_i32, %c0_i32_0 : i32, i32
  }
  func.func @transform_6(%arg0: i32) -> (i32, i32) {
    %c0_i32 = arith.constant 0 : i32
    %c0_i32_0 = arith.constant 0 : i32
    %c0_i32_1 = arith.constant 0 : i32
    return %c0_i32, %c0_i32_0 : i32, i32
  }
}

</mosaic_0001>

<bundles_post_ra>
// kernel: vgg_mult_l1_loss.1
= control target key start
LH: loop header
LB: loop body
LE: loop exit
PB: predicated region body
PF: predicated region fallthrough
CT: control target
= control target key end

     0   :  { %12 = vsyncpa [#allocation7], 0  ;;  %s2203_s0 = inlined_call_operand.vmem [shape: f32[2,2,16,48], index: 0, kind: input, shape index: {}]   ;;  %s2204_s1 = inlined_call_operand.vmem [shape: bf16[3,48,128], index: 1, kind: input, shape index: {}]   ;;  %s2205_s2 = inlined_call_operand.vmem [shape: f32[1,128], index: 2, kind: input, shape index: {}]   ;;  %s2206_s3 = inlined_call_operand.vmem [shape: bf16[3,64,128], index: 3, kind: input, shape index: {}]   ;;  %s2207_s4 = inlined_call_operand.vmem [shape: f32[1,128], index: 4, kind: input, shape index: {}]   ;;  %s2208_s5 = inlined_call_operand.hbm [shape: f32[1,1], index: 5, kind: output, shape index: {0}]   ;;  %s2209_s6 = inlined_call_operand.hbm [shape: f32[1,1], index: 6, kind: output, shape index: {1}]  }
   0x1   :  { %13 = vsyncpa [#allocation9], 0  ;;  %s1891_s21 = smov 0  }
   0x2 LB: > { %s1897_s22 = sadd.s32 4294967295, %s1847_s21   ;;  %p1565_p0 = scmp.ge.s32.totalorder %s1847_s21, 1  ;;  %s1847_s21 = sphi %s1891_s21, %s19_s21  }
   0x3   : > { %p207_p1 = scmp.lt.s32.totalorder %s1847_s21, 3 }
   0x5   : > { %p208_p2 = pnand %p1565_p0, %p207_p1 }
   0x6   : > { %p232_p3 = scmp.lt.s32.totalorder (!%p208_p2), %s1897_s22, 1  ;;  %p1568_p4 = scmp.ne.s32.totalorder (!%p208_p2), %s1897_s22, 0 }
   0x7   : > { %211 = sbr.rel (%p208_p2) target bundleno = 1034 (0x40a), region = 40 }
   0xc   : > { %s233_s23 = scalar_select %p232_p3, %s1897_s22, 1 }
   0xd   : > { %241 = sbr.rel (%p1568_p4) target bundleno = 21 (0x15), region = 44 }
   0xe   : > { %s1636_s24 = sshll.u32 %s233_s23, 5 }
   0xf   : > { %s1906_s27 = scalar_lea.vmem %s2203_s0, %s1636_s24 }
  0x12   : > { %vm242_vm0 = vcmask 519168   ;;  %vm244_vm1 = vcmask 392192   ;;  %v1849_v0 = vmov 0.0  }
  0x13   : > { %243 = vst.msk [vmem:[#allocation4] sm:$0xf] %vm242_vm0, %v1849_v0 }
  0x14   : > { %245 = vst.msk [vmem:[#allocation5] sm:$0xff] %vm244_vm1, %v1849_v0  ;;  %246 = vst.msk [vmem:[#allocation5 + $0x8] sm:$0xff] %vm244_vm1, %v1849_v0 }
  0x15 PF: > { %v1764_v1 = vld [vmem:[%s2204_s1 + $0x28] sm:$0xff]   ;;  %vm259_vm2 = vcmask 392192   ;;  %v1765_v2 = vld [vmem:[%s2204_s1 + $0x10] sm:$0xff]   ;;  %v1766_v3 = vld [vmem:[%s2204_s1 + $0x20] sm:$0xff]   ;;  %v1850_v4 = vmov 0.0   ;;  %vm264_vm3 = vcmask 386048   ;;  %v557_v48 = vlaneseq }
  0x16   : > { %1667 = vmatprep.subr.bf16.mxu0 %v1764_v1  ;;  %262 = vst.msk [vmem:[#allocation2] sm:$0xff] %vm259_vm2, %v1850_v4  ;;  %263 = vst.msk [vmem:[#allocation2 + $0x8] sm:$0xff] %vm259_vm2, %v1850_v4  ;;  %1677 = vmatprep.subr.bf16.mxu1 %v1765_v2  ;;  %v1767_v5 = vld [vmem:[%s2204_s1 + $0x8] sm:$0xff]   ;;  %v1768_v6 = vld [vmem:[%s2204_s1 + $0x18] sm:$0xff]   ;;  %v1851_v46 = vmov 1966171168  }
  0x17   : > { %266 = vst.msk [vmem:[#allocation2 + $0x18] sm:$0xff] %vm259_vm2, %v1850_v4  ;;  %267 = vst.msk [vmem:[#allocation2 + $0x20] sm:$0xff] %vm259_vm2, %v1850_v4  ;;  %1668 = vmatpush3.bf16.msra.mxu0 %v1764_v1  ;;  %1678 = vmatpush3.bf16.msra.mxu1 %v1765_v2  ;;  %v1769_v7 = vld [vmem:[%s2204_s1] sm:$0xff]   ;;  %v248_v9 = vld [vmem:[%s1906_s27 + $0x8] sm:$0xff]  ;;  %v555_v47 = vunpack.c.l.s4 %v1851_v46  ;;  %v558_v53 = vshrl.u32 %v557_v48, 7  ;;  %s1852_s26 = smov 64  }
  0x18   : > { %265 = vst.msk [vmem:[#allocation2 + $0x10] sm:$0x3] %vm264_vm3, %v1850_v4  ;;  %268 = vst.msk [vmem:[#allocation2 + $0x28] sm:$0x3] %vm264_vm3, %v1850_v4  ;;  %1669 = vmatprep.subr.bf16.mxu0 %v1766_v3  ;;  %1679 = vmatprep.subr.bf16.mxu1 %v1767_v5  ;;  %v247_v8 = vld [vmem:[%s1906_s27] sm:$0xff]  ;;  %v249_v10 = vld [vmem:[%s1906_s27 + $0x10] sm:$0xff] }
  0x19   : > { %v250_v11 = vld [vmem:[%s1906_s27 + $0x18] sm:$0xff]  ;;  %v253_v14 = vsub.f32 %v247_v8, %v249_v10  ;;  %269 = vst.msk [vmem:[#allocation2 + $0x1] sm:$0xff] %vm259_vm2, %v247_v8  ;;  %270 = vst.msk [vmem:[#allocation2 + $0x9] sm:$0xff] %vm259_vm2, %v248_v9  ;;  %v1770_v16 = vld [vmem:[%s2204_s1 + $0x40] sm:$0xff]   ;;  %v556_v52 = vunpack.c.0.s8 %v555_v47  ;;  %vm877_vm4 = vcmask 523264   ;;  %vm879_vm5 = vcmask 517120  }
  0x1a   : > { %271 = vst.msk [vmem:[#allocation2 + $0x19] sm:$0xff] %vm259_vm2, %v249_v10  ;;  %v254_v15 = vsub.f32 %v248_v9, %v250_v11  ;;  %272 = vst.msk [vmem:[#allocation2 + $0x21] sm:$0xff] %vm259_vm2, %v250_v11  ;;  %v1771_v24 = vld [vmem:[%s2204_s1 + $0x38] sm:$0xff]   ;;  %v1772_v36 = vld [vmem:[%s2204_s1 + $0x30] sm:$0xff]   ;;  %vm1853_vm6 = vmmov 0   ;;  %vm1456_vm7 = vcmask 519168  }
  0x1b   : > { %1670 = vmatpush3.bf16.msra.mxu0 %v1766_v3  ;;  %v251_v12 = vld [vmem:[#allocation5] sm:$0xff]  ;;  %v252_v13 = vld [vmem:[#allocation5 + $0x8] sm:$0xff]  ;;  %1680 = vmatpush3.bf16.msra.mxu1 %v1767_v5  ;;  %v255_v17 = vand.u32 2147483647, %v253_v14  ;;  %v1967_v62 = vsub.s32 %v556_v52, %v558_v53  ;;  %878 = vst.msk [vmem:[#allocation3] sm:$0xff] %vm877_vm4, %v1850_v4  ;;  %881 = vst.msk [vmem:[#allocation3 + $0x10] sm:$0xff] %vm877_vm4, %v1850_v4 }
  0x1c   : > { %1671 = vmatprep.subr.bf16.mxu0 %v1768_v6  ;;  %1681 = vmatprep.subr.bf16.mxu1 %v1769_v7  ;;  %v256_v18 = vand.u32 2147483647, %v254_v15  ;;  %v1596_v55 = vld [vmem:[%s2205_s2] ss:$0 sm:$0xff]  ;;  %880 = vst.msk [vmem:[#allocation3 + $0x8] sm:$0x3] %vm879_vm5, %v1850_v4 }
  0x1d   : > { %v257_v19 = vadd.f32 %v255_v17, %v251_v12  ;;  %882 = vst.msk [vmem:[#allocation3 + $0x18] sm:$0x3] %vm879_vm5, %v1850_v4  ;;  %p1629_p5 = scmp.ne.s32.totalorder %s1897_s22, 1 }
  0x1e   : > { %v258_v20 = vadd.f32 %v256_v18, %v252_v13 }
  0x1f   : > { %1672 = vmatpush3.bf16.msra.mxu0 %v1768_v6  ;;  %1682 = vmatpush3.bf16.msra.mxu1 %v1769_v7  ;;  %260 = vst.msk [vmem:[#allocation5] sm:$0xff] %vm259_vm2, %v257_v19 }
  0x20   : > { %1687 = vmatprep.subr.bf16.mxu0 %v1770_v16  ;;  %1697 = vmatprep.subr.bf16.mxu1 %v1850_v4  ;;  %261 = vst.msk [vmem:[#allocation5 + $0x8] sm:$0xff] %vm259_vm2, %v258_v20  ;;  %v285_v21 = vld [vmem:[#allocation2 + $0x1] sm:$0xff]  ;;  %v286_v22 = vld [vmem:[#allocation2 + $0x9] sm:$0xff] }
  0x21   : > { %v273_v23 = vld [vmem:[#allocation2] sm:$0xff]  ;;  %v289_v25 = vpack.c.bf16 %v286_v22, %v285_v21  ;;  %v274_v26 = vld [vmem:[#allocation2 + $0x8] sm:$0xff]  ;;  %v275_v31 = vld [vmem:[#allocation2 + $0x18] sm:$0xff] }
  0x22   : > { %v287_v27 = vld [vmem:[#allocation2 + $0x19] sm:$0xff]  ;;  %v288_v28 = vld [vmem:[#allocation2 + $0x21] sm:$0xff]  ;;  %v277_v29 = vpack.c.bf16 %v274_v26, %v273_v23  ;;  %v445_v35 = vld [vmem:[#allocation2 + $0xa] sm:$0xff] }
  0x23   : > { %v290_v30 = vpack.c.bf16 %v288_v28, %v287_v27  ;;  %v276_v32 = vld [vmem:[#allocation2 + $0x20] sm:$0xff]  ;;  %1673 = vmatprep.mubr.msk.bf16.mxu0 %vm259_vm2, %v289_v25 }
  0x24   : > { %v444_v33 = vld [vmem:[#allocation2 + $0x2] sm:$0xff]  ;;  %v278_v34 = vpack.c.bf16 %v276_v32, %v275_v31  ;;  %1683 = vmatprep.mubr.msk.bf16.mxu1 %vm259_vm2, %v277_v29  ;;  %v446_v38 = vld [vmem:[#allocation2 + $0x1a] sm:$0xff] }
  0x25   : > { %1674 = vmatmul.mubr.msk.bf16.vlgmr.msra.gmra.mxu0 %vm259_vm2, %v290_v30  ;;  %v448_v37 = vpack.c.bf16 %v445_v35, %v444_v33  ;;  %v447_v39 = vld [vmem:[#allocation2 + $0x22] sm:$0xff] }
  0x26   : > { %1684 = vmatmul.mubr.msk.bf16.vlgmr.msra.gmra.mxu1 %vm259_vm2, %v278_v34  ;;  %1688 = vmatpush3.bf16.msra.mxu0 %v1770_v16  ;;  %v449_v40 = vpack.c.bf16 %v447_v39, %v446_v38 }
  0x27   : > { %1689 = vmatprep.subr.bf16.mxu0 %v1771_v24  ;;  %1693 = vmatprep.mubr.msk.bf16.mxu0 %vm259_vm2, %v448_v37 }
  0x28   : > { %1705 = vmatprep.mubr.msk.bf16.mxu1 %vm1853_vm6, %v1850_v4 }
  0x2a   : > { %1690 = vmatpush3.bf16.msra.mxu0 %v1771_v24 }
  0x2b   : > { %1691 = vmatprep.subr.bf16.mxu0 %v1772_v36 }
  0x2e   : > { %1692 = vmatpush3.bf16.msra.mxu0 %v1772_v36 }
  0x2f   : > { %1709 = vmatprep.subr.bf16.mxu0 %v1850_v4 }
  0x31   : > { %1694 = vmatmul.mubr.msk.bf16.vlgmr.msra.gmra.mxu0 %vm259_vm2, %v449_v40 }
  0x32   : > { %1717 = vmatprep.mubr.msk.bf16.mxu0 %vm1853_vm6, %v1850_v4 }
  0xe5   : > { %v1675_v41 = vpop.f32.mrf.mxu0 }
  0xe6   : > { %v1685_v43 = vpop.f32.mrf.mxu1 }
  0xe7   : > { %v356_v42 = vpop.f32.mrf.mxu0  ;;  %v438_v50 = vadd.f32 %v1685_v43, %v1675_v41 }
  0xe8   : > { %v429_v45 = vpop.f32.mrf.mxu1 }
  0xe9   : > { %v1676_v44 = vpop.f32.mrf.mxu0  ;;  %v430_v56 = vadd.f32 %v429_v45, %v356_v42 }
  0xea   : > { %v1686_v51 = vpop.f32.mrf.mxu1 }
  0xeb   : > { %v359_v49 = vpop.f32.mrf.mxu0  ;;  %v441_v59 = vadd.f32 %v1686_v51, %v1676_v44 }
  0xec   : > { %v432_v60 = vpop.f32.mrf.mxu1 }
  0xed   : > { %v433_v5 = vadd.f32 %v432_v60, %v359_v49 }
  0xf1   : > { %v1695_v54 = vpop.f32.mrf.mxu0 }
  0xf2   : > { %v532_v57 = vadd.f32 %v1695_v54, %v438_v50 }
  0xf3   : > { %v515_v58 = vpop.f32.mrf.mxu0 }
  0xf4   : > { %v543_v61 = vadd.f32 %v1596_v55, %v532_v57  ;;  %v530_v63 = vadd.f32 %v515_v58, %v430_v56 }
  0xf5   : > { %v1696_v0 = vpop.f32.mrf.mxu0 }
  0xf6   : > { %v547_v1 = vmax.f32 %v543_v61, 0.0  ;;  %v541_v2 = vadd.f32 %v1596_v55, %v530_v63  ;;  %v533_v3 = vadd.f32 %v1696_v0, %v441_v59 }
  0xf7   : > { %v518_v6 = vpop.f32.mrf.mxu0 }
  0xf8   : > { %v651_v7 = vcombine.high %v547_v1, %v547_v1  ;;  %v658_v8 = vrot.slane %v547_v1, %v1967_v62  ;;  %v545_v9 = vmax.f32 %v541_v2, 0.0  ;;  %v544_v10 = vadd.f32 %v1596_v55, %v533_v3 }
  0xf9   : > { %v531_v11 = vadd.f32 %v518_v6, %v433_v5 }
  0xfa   : > { %v553_v12 = vcombine.high %v545_v9, %v545_v9  ;;  %v560_v13 = vrot.slane %v545_v9, %v1967_v62  ;;  %v666_v14 = vcombine.high %v658_v8, %v658_v8  ;;  %v674_v15 = vrot.slane %v658_v8, %v1967_v62 }
  0xfb   : > { %v665_v16 = vrot.slane %v651_v7, %v1967_v62  ;;  %v542_v19 = vadd.f32 %v1596_v55, %v531_v11  ;;  %v548_v20 = vmax.f32 %v544_v10, 0.0 }
  0xfc   : > { %v567_v17 = vrot.slane %v553_v12, %v1967_v62  ;;  %v568_v18 = vcombine.high %v560_v13, %v560_v13  ;;  %v688_v21 = vrot.slane %v666_v14, %v1967_v62  ;;  %v696_v24 = vcombine.high %v674_v15, %v674_v15 }
  0xfd   : > { %v546_v27 = vmax.f32 %v542_v19, 0.0  ;;  %v667_v28 = vcombine.high %v665_v16, %v665_v16  ;;  %v707_v29 = vrot.slane %v548_v20, %v1967_v62  ;;  %v576_v31 = vrot.slane %v560_v13, %v1967_v62  ;;  %v1774_v19 = vld [vmem:[%s2206_s3 + $0x18] sm:$0xff]  }
  0xfe   : > { %v569_v22 = vcombine.high %v567_v17, %v567_v17  ;;  %v1975_v23 = vmax.f32 %v674_v15, %v688_v21  ;;  %v698_v25 = vcombine.high %v688_v21, %v688_v21  ;;  %v590_v26 = vrot.slane %v568_v18, %v1967_v62  ;;  %v1773_v18 = vld [vmem:[%s2206_s3 + $0x38] sm:$0xff]   ;;  %1710 = vmatpush3.bf16.msra.mxu0 %v1774_v19  ;;  %v1775_v21 = vld [vmem:[%s2206_s3 + $0x30] sm:$0xff]  }
  0xff   : > { %v695_v33 = vrot.slane %v667_v28, %v1967_v62  ;;  %v583_v35 = vrot.slane %v567_v17, %v1967_v62  ;;  %v681_v36 = vrot.slane %v665_v16, %v1967_v62  ;;  %v602_v37 = vcombine.high %v546_v27, %v546_v27  ;;  %1698 = vmatpush3.bf16.msra.mxu1 %v1773_v18 }
 0x100   : > { %829 = vrot.lane.b32.xlu0 %v1975_v23, %s1852_s26  ;;  %v1981_v30 = vmax.f32 %v696_v24, %v698_v25  ;;  %v597_v32 = vrot.slane %v569_v22, %v1967_v62  ;;  %v1988_v34 = vmax.f32 %v576_v31, %v590_v26  ;;  %v609_v38 = vrot.slane %v546_v27, %v1967_v62  ;;  %v1776_v22 = vld [vmem:[%s2206_s3 + $0x10] sm:$0xff]   ;;  %v1777_v24 = vld [vmem:[%s2206_s3 + $0x28] sm:$0xff]   ;;  %v1780_v27 = vld [vmem:[%s2206_s3] sm:$0xff]  }
 0x101   : > { %v715_v39 = vcombine.high %v707_v29, %v707_v29  ;;  %v699_v41 = vcombine.high %v695_v33, %v695_v33  ;;  %v1999_v42 = vmax.f32 %v681_v36, %v695_v33  ;;  %v697_v43 = vcombine.high %v681_v36, %v681_v36  ;;  %1699 = vmatprep.subr.bf16.mxu1 %v1850_v4  ;;  %v1778_v25 = vld [vmem:[%s2206_s3 + $0x8] sm:$0xff]  }
 0x102   : > { %831 = vrot.lane.b32.xlu1 %v1981_v30, %s1852_s26  ;;  %v1995_v40 = vmax.f32 %v583_v35, %v597_v32  ;;  %v600_v44 = vcombine.high %v590_v26, %v590_v26  ;;  %v700_v45 = vcombine.high %v548_v20, %v548_v20  ;;  %v616_v46 = vrot.slane %v602_v37, %v1967_v62  ;;  %v1779_v26 = vld [vmem:[%s2206_s3 + $0x20] sm:$0xff]  }
 0x103   : > { %v617_v47 = vcombine.high %v609_v38, %v609_v38  ;;  %v2004_v48 = vmax.f32 %v697_v43, %v699_v41  ;;  %v598_v49 = vcombine.high %v576_v31, %v576_v31  ;;  %v601_v50 = vcombine.high %v597_v32, %v597_v32  ;;  %1711 = vmatprep.subr.bf16.mxu0 %v1850_v4 }
 0x104   : > { %813 = vrot.lane.b32.xlu0 %v1988_v34, %s1852_s26  ;;  %v737_v51 = vrot.slane %v715_v39, %v1967_v62  ;;  %v599_v53 = vcombine.high %v583_v35, %v583_v35  ;;  %v723_v54 = vrot.slane %v707_v29, %v1967_v62  ;;  %v714_v55 = vrot.slane %v700_v45, %v1967_v62 }
 0x105   : > { %v2009_v52 = vmax.f32 %v598_v49, %v600_v44  ;;  %v639_v58 = vrot.slane %v617_v47, %v1967_v62  ;;  %v618_v59 = vcombine.high %v616_v46, %v616_v46  ;;  %v625_v63 = vrot.slane %v609_v38, %v1967_v62  ;;  %1700 = vmatpush3.bf16.msra.mxu1 %v1775_v21 }
 0x106   : > { %817 = vrot.lane.b32.xlu1 %v1995_v40, %s1852_s26  ;;  %v2015_v56 = vmax.f32 %v599_v53, %v601_v50  ;;  %v747_v57 = vcombine.high %v737_v51, %v737_v51  ;;  %v2020_v60 = vmax.f32 %v723_v54, %v737_v51  ;;  %v745_v61 = vcombine.high %v723_v54, %v723_v54 }
 0x107   : > { %v649_v1 = vcombine.high %v639_v58, %v639_v58  ;;  %v646_v2 = vrot.slane %v618_v59, %v1967_v62  ;;  %v716_v3 = vcombine.high %v714_v55, %v714_v55  ;;  %v2030_v5 = vmax.f32 %v625_v63, %v639_v58  ;;  %1712 = vmatpush3.bf16.msra.mxu0 %v1776_v22 }
 0x108   : > { %833 = vrot.lane.b32.xlu0 %v1999_v42, %s1852_s26  ;;  %v2025_v0 = vmax.f32 %v745_v61, %v747_v57  ;;  %v647_v6 = vcombine.high %v625_v63, %v625_v63  ;;  %v632_v7 = vrot.slane %v616_v46, %v1967_v62  ;;  %v730_v13 = vrot.slane %v714_v55, %v1967_v62 }
 0x109   : > { %v650_v9 = vcombine.high %v646_v2, %v646_v2  ;;  %v744_v10 = vrot.slane %v716_v3, %v1967_v62  ;;  %1701 = vmatprep.subr.bf16.mxu1 %v1850_v4  ;;  %1713 = vmatprep.subr.bf16.mxu0 %v1850_v4 }
 0x10a   : > { %835 = vrot.lane.b32.xlu1 %v2004_v48, %s1852_s26  ;;  %v2035_v8 = vmax.f32 %v647_v6, %v649_v1  ;;  %v2040_v11 = vmax.f32 %v632_v7, %v646_v2  ;;  %v648_v12 = vcombine.high %v632_v7, %v632_v7  ;;  %v746_v17 = vcombine.high %v730_v13, %v730_v13 }
 0x10b   : > { %v748_v15 = vcombine.high %v744_v10, %v744_v10  ;;  %v2049_v16 = vmax.f32 %v730_v13, %v744_v10  ;;  %1702 = vmatpush3.bf16.msra.mxu1 %v1777_v24  ;;  %1714 = vmatpush3.bf16.msra.mxu0 %v1778_v25  ;;  %v1781_v25 = vld [vmem:[%s2206_s3 + $0x58] sm:$0xff]  }
 0x10c   : > { %815 = vrot.lane.b32.xlu0 %v2009_v52, %s1852_s26  ;;  %v2045_v14 = vmax.f32 %v648_v12, %v650_v9  ;;  %1703 = vmatprep.subr.bf16.mxu1 %v1850_v4 }
 0x10d   : > { %v2059_v20 = vmax.f32 %v746_v17, %v748_v15  ;;  %1715 = vmatprep.subr.bf16.mxu0 %v1850_v4 }
 0x10e   : > { %819 = vrot.lane.b32.xlu1 %v2015_v56, %s1852_s26 }
 0x10f   : > { %1704 = vmatpush3.bf16.msra.mxu1 %v1779_v26  ;;  %1716 = vmatpush3.bf16.msra.mxu0 %v1780_v27 }
 0x110   : > { %837 = vrot.lane.b32.xlu0 %v2020_v60, %s1852_s26  ;;  %1721 = vmatprep.subr.bf16.mxu1 %v1850_v4 }
 0x112   : > { %839 = vrot.lane.b32.xlu1 %v2025_v0, %s1852_s26 }
 0x114   : > { %821 = vrot.lane.b32.xlu0 %v2030_v5, %s1852_s26 }
 0x116   : > { %823 = vrot.lane.b32.xlu1 %v2035_v8, %s1852_s26 }
 0x118   : > { %825 = vrot.lane.b32.xlu0 %v2040_v11, %s1852_s26 }
 0x11a   : > { %827 = vrot.lane.b32.xlu1 %v2045_v14, %s1852_s26 }
 0x11c   : > { %841 = vrot.lane.b32.xlu0 %v2049_v16, %s1852_s26 }
 0x11e   : > { %843 = vrot.lane.b32.xlu1 %v2059_v20, %s1852_s26 }
 0x172   : > { %v830_v28 = vpop.permute.xlu0 %829 }
 0x174   : > { %v832_v29 = vpop.permute.xlu1 %831 }
 0x175   : > { %v870_v53 = vmax.f32 %v1981_v30, %v832_v29 }
 0x176   : > { %v814_v31 = vpop.permute.xlu0 %813 }
 0x177   : > { %v861_v46 = vmax.f32 %v1988_v34, %v814_v31 }
 0x178   : > { %v818_v32 = vpop.permute.xlu1 %817 }
 0x179   : > { %v863_v43 = vmax.f32 %v1995_v40, %v818_v32  ;;  %v869_v40 = vmax.f32 %v1975_v23, %v830_v28  ;;  %v1782_v32 = vld [vmem:[%s2206_s3 + $0x50] sm:$0xff]  }
 0x17a   : > { %v834_v33 = vpop.permute.xlu0 %833 }
 0x17b   : > { %v871_v54 = vmax.f32 %v1999_v42, %v834_v33  ;;  %v948_v30 = vcombine.low %v869_v40, %v870_v53  ;;  %v1783_v33 = vld [vmem:[%s2206_s3 + $0x48] sm:$0xff]  }
 0x17c   : > { %v836_v35 = vpop.permute.xlu1 %835 }
 0x17d   : > { %v872_v47 = vmax.f32 %v2004_v48, %v836_v35  ;;  %v1784_v35 = vld [vmem:[%s2206_s3 + $0x40] sm:$0xff]  }
 0x17e   : > { %v816_v36 = vpop.permute.xlu0 %815 }
 0x17f   : > { %v862_v44 = vmax.f32 %v2009_v52, %v816_v36  ;;  %v949_v52 = vcombine.low %v871_v54, %v872_v47 }
 0x180   : > { %v820_v37 = vpop.permute.xlu1 %819 }
 0x181   : > { %v864_v39 = vmax.f32 %v2015_v56, %v820_v37  ;;  %v899_v55 = vcombine.low %v861_v46, %v862_v44  ;;  %v965_v23 = vrot.slane %v949_v52, %v1967_v62 }
 0x182   : > { %v838_v38 = vpop.permute.xlu0 %837 }
 0x183   : > { %v900_v49 = vcombine.low %v863_v43, %v864_v39  ;;  %v909_v42 = vrot.slane %v899_v55, %v1967_v62  ;;  %v873_v1 = vmax.f32 %v2020_v60, %v838_v38 }
 0x184   : > { %v840_v41 = vpop.permute.xlu1 %839 }
 0x185   : > { %v916_v58 = vrot.slane %v900_v49, %v1967_v62  ;;  %v874_v34 = vmax.f32 %v2025_v0, %v840_v41 }
 0x186   : > { %v822_v45 = vpop.permute.xlu0 %821 }
 0x187   : > { %v865_v57 = vmax.f32 %v2030_v5, %v822_v45  ;;  %v931_v5 = vcombine.low %v909_v42, %v916_v58  ;;  %v950_v6 = vcombine.low %v873_v1, %v874_v34 }
 0x188   : > { %v824_v50 = vpop.permute.xlu1 %823 }
 0x189   : > { %v866_v51 = vmax.f32 %v2035_v8, %v824_v50  ;;  %v972_v15 = vrot.slane %v950_v6, %v1967_v62 }
 0x18a   : > { %v826_v56 = vpop.permute.xlu0 %825 }
 0x18b   : > { %v901_v59 = vcombine.low %v865_v57, %v866_v51  ;;  %v867_v61 = vmax.f32 %v2040_v11, %v826_v56  ;;  %v958_v11 = vrot.slane %v948_v30, %v1967_v62 }
 0x18c   : > { %v828_v48 = vpop.permute.xlu1 %827 }
 0x18d   : > { %v868_v63 = vmax.f32 %v2045_v14, %v828_v48  ;;  %v923_v0 = vrot.slane %v901_v59, %v1967_v62  ;;  %v980_v60 = vcombine.low %v958_v11, %v965_v23  ;;  %v939_v14 = vrot.slane %v931_v5, %v1967_v62 }
 0x18e   : > { %v842_v2 = vpop.permute.xlu0 %841 }
 0x18f   : > { %v902_v3 = vcombine.low %v867_v61, %v868_v63  ;;  %v875_v9 = vmax.f32 %v2049_v16, %v842_v2  ;;  %v988_v22 = vrot.slane %v980_v60, %v1967_v62 }
 0x190   : > { %v844_v7 = vpop.permute.xlu1 %843 }
 0x191   : > { %v930_v8 = vrot.slane %v902_v3, %v1967_v62  ;;  %v876_v10 = vmax.f32 %v2059_v20, %v844_v7 }
 0x193   : > { %v932_v12 = vcombine.low %v923_v0, %v930_v8  ;;  %v951_v13 = vcombine.low %v875_v9, %v876_v10 }
 0x195   : > { %v946_v17 = vrot.slane %v932_v12, %v1967_v62  ;;  %v979_v18 = vrot.slane %v951_v13, %v1967_v62 }
 0x197   : > { %v947_v19 = vcombine.low %v939_v14, %v946_v17  ;;  %v981_v21 = vcombine.low %v972_v15, %v979_v18 }
 0x199   : > { %v995_v16 = vrot.slane %v981_v21, %v1967_v62  ;;  %999 = vst.msk [vmem:[#allocation3 + $0x1] sm:$0xff] %vm877_vm4, %v947_v19 }
 0x19b   : > { %v996_v20 = vcombine.low %v988_v22, %v995_v16 }
 0x19d   : > { %1000 = vst.msk [vmem:[#allocation3 + $0x11] sm:$0xff] %vm877_vm4, %v996_v20 }
 0x1a0   : > { %v1012_v24 = vld [vmem:[#allocation3 + $0x1] sm:$0xff] }
 0x1a1   : > { %v1001_v27 = vld [vmem:[#allocation3] sm:$0xff] }
 0x1a2   : > { %v1160_v37 = vld [vmem:[#allocation3 + $0x2] sm:$0xff] }
 0x1a4   : > { %v1013_v26 = vld [vmem:[#allocation3 + $0x11] sm:$0xff] }
 0x1a5   : > { %v1002_v28 = vld [vmem:[#allocation3 + $0x10] sm:$0xff]  ;;  %v1014_v29 = vpack.c.bf16 %v1013_v26, %v1012_v24 }
 0x1a6   : > { %v1003_v31 = vpack.c.bf16 %v1002_v28, %v1001_v27  ;;  %v1161_v36 = vld [vmem:[#allocation3 + $0x12] sm:$0xff] }
 0x1a7   : > { %1706 = vmatmul.mubr.msk.bf16.vlgmr.msra.gmra.mxu1 %vm877_vm4, %v1014_v29  ;;  %v1162_v38 = vpack.c.bf16 %v1161_v36, %v1160_v37 }
 0x1a8   : > { %1718 = vmatmul.mubr.msk.bf16.vlgmr.msra.gmra.mxu0 %vm877_vm4, %v1003_v31  ;;  %1722 = vmatpush3.bf16.msra.mxu1 %v1781_v25 }
 0x1a9   : > { %1729 = vmatprep.mubr.msk.bf16.mxu1 %vm1853_vm6, %v1850_v4  ;;  %1723 = vmatprep.subr.bf16.mxu1 %v1850_v4 }
 0x1ac   : > { %1724 = vmatpush3.bf16.msra.mxu1 %v1782_v32 }
 0x1ad   : > { %1725 = vmatprep.subr.bf16.mxu1 %v1850_v4 }
 0x1b0   : > { %1726 = vmatpush3.bf16.msra.mxu1 %v1783_v33 }
 0x1b1   : > { %1727 = vmatprep.subr.bf16.mxu1 %v1850_v4  ;;  %v1628_v4 = vld [vmem:[%s2207_s4] ss:$0 sm:$0xff] }
 0x1b4   : > { %1728 = vmatpush3.bf16.msra.mxu1 %v1784_v35 }
 0x1b7   : > { %1730 = vmatmul.mubr.msk.bf16.vlgmr.msra.gmra.mxu1 %vm877_vm4, %v1162_v38 }
 0x267   : > { %v1085_v39 = vpop.f32.mrf.mxu1 }
 0x268   : > { %v1153_v41 = vpop.f32.mrf.mxu0 }
 0x269   : > { %v1707_v43 = vpop.f32.mrf.mxu1  ;;  %v1154_v50 = vadd.f32 %v1153_v41, %v1085_v39 }
 0x26a   : > { %v1719_v44 = vpop.f32.mrf.mxu0 }
 0x26b   : > { %v1088_v45 = vpop.f32.mrf.mxu1 }
 0x26c   : > { %v1156_v46 = vpop.f32.mrf.mxu0 }
 0x26d   : > { %v1708_v47 = vpop.f32.mrf.mxu1  ;;  %v1157_v55 = vadd.f32 %v1156_v46, %v1088_v45 }
 0x26e   : > { %v1720_v49 = vpop.f32.mrf.mxu0 }
 0x277   : > { %v1233_v51 = vpop.f32.mrf.mxu1 }
 0x278   : > { %v1240_v53 = vadd.f32 %v1233_v51, %v1154_v50 }
 0x279   : > { %v1731_v54 = vpop.f32.mrf.mxu1 }
 0x27a   : > { %v1249_v56 = vadd.f32 %v1628_v4, %v1240_v53 }
 0x27b   : > { %v1236_v57 = vpop.f32.mrf.mxu1 }
 0x27c   : > { %v1251_v40 = vmax.f32 %v1249_v56, 0.0  ;;  %v1241_v52 = vadd.f32 %v1236_v57, %v1157_v55 }
 0x27d   : > { %v1732_v58 = vpop.f32.mrf.mxu1 }
 0x27e   : > { %v1255_v34 = vcombine.high %v1251_v40, %v1251_v40  ;;  %v1262_v48 = vrot.slane %v1251_v40, %v1967_v62  ;;  %v1250_v59 = vadd.f32 %v1628_v4, %v1241_v52 }
 0x280   : > { %v1269_v61 = vrot.slane %v1255_v34, %v1967_v62  ;;  %v1270_v63 = vcombine.high %v1262_v48, %v1262_v48  ;;  %v1252_v30 = vmax.f32 %v1250_v59, 0.0  ;;  %v1278_v42 = vrot.slane %v1262_v48, %v1967_v62  ;;  %v1417_v59 = vld [vmem:[#allocation4] sm:$0xf] }
 0x282   : > { %v1304_v1 = vcombine.high %v1252_v30, %v1252_v30  ;;  %v1311_v2 = vrot.slane %v1252_v30, %v1967_v62  ;;  %v1292_v3 = vrot.slane %v1270_v63, %v1967_v62  ;;  %v1300_v23 = vcombine.high %v1278_v42, %v1278_v42 }
 0x283   : > { %v1271_v5 = vcombine.high %v1269_v61, %v1269_v61  ;;  %v1285_v6 = vrot.slane %v1269_v61, %v1967_v62 }
 0x284   : > { %v1318_v7 = vrot.slane %v1304_v1, %v1967_v62  ;;  %v1319_v0 = vcombine.high %v1311_v2, %v1311_v2  ;;  %v1369_v8 = vmax.f32 %v1278_v42, %v1292_v3  ;;  %v1302_v9 = vcombine.high %v1292_v3, %v1292_v3 }
 0x285   : > { %v1299_v10 = vrot.slane %v1271_v5, %v1967_v62  ;;  %v1301_v15 = vcombine.high %v1285_v6, %v1285_v6  ;;  %v1327_v17 = vrot.slane %v1311_v2, %v1967_v62 }
 0x286   : > { %1385 = vrot.lane.b32.xlu0 %v1369_v8, %s1852_s26  ;;  %v1370_v11 = vmax.f32 %v1300_v23, %v1302_v9  ;;  %v1341_v12 = vrot.slane %v1319_v0, %v1967_v62  ;;  %v1320_v13 = vcombine.high %v1318_v7, %v1318_v7  ;;  %v1334_v20 = vrot.slane %v1318_v7, %v1967_v62 }
 0x287   : > { %v1303_v60 = vcombine.high %v1299_v10, %v1299_v10  ;;  %v1371_v14 = vmax.f32 %v1285_v6, %v1299_v10  ;;  %v1349_v16 = vcombine.high %v1327_v17, %v1327_v17 }
 0x288   : > { %1387 = vrot.lane.b32.xlu1 %v1370_v11, %s1852_s26  ;;  %v1351_v19 = vcombine.high %v1341_v12, %v1341_v12  ;;  %v1348_v21 = vrot.slane %v1320_v13, %v1967_v62  ;;  %v1373_v22 = vmax.f32 %v1327_v17, %v1341_v12  ;;  %v1350_v27 = vcombine.high %v1334_v20, %v1334_v20 }
 0x289   : > { %v1372_v18 = vmax.f32 %v1301_v15, %v1303_v60 }
 0x28a   : > { %1389 = vrot.lane.b32.xlu0 %v1371_v14, %s1852_s26  ;;  %v1374_v24 = vmax.f32 %v1349_v16, %v1351_v19  ;;  %v1352_v25 = vcombine.high %v1348_v21, %v1348_v21  ;;  %v1375_v26 = vmax.f32 %v1334_v20, %v1348_v21 }
 0x28c   : > { %1391 = vrot.lane.b32.xlu1 %v1372_v18, %s1852_s26  ;;  %v1376_v28 = vmax.f32 %v1350_v27, %v1352_v25 }
 0x28e   : > { %1393 = vrot.lane.b32.xlu0 %v1373_v22, %s1852_s26 }
 0x290   : > { %1395 = vrot.lane.b32.xlu1 %v1374_v24, %s1852_s26 }
 0x292   : > { %1397 = vrot.lane.b32.xlu0 %v1375_v26, %s1852_s26 }
 0x294   : > { %1399 = vrot.lane.b32.xlu1 %v1376_v28, %s1852_s26 }
 0x2f8   : > { %v1386_v29 = vpop.permute.xlu0 %1385 }
 0x2f9   : > { %v1409_v38 = vmax.f32 %v1369_v8, %v1386_v29 }
 0x2fa   : > { %v1388_v31 = vpop.permute.xlu1 %1387 }
 0x2fb   : > { %v1410_v39 = vmax.f32 %v1370_v11, %v1388_v31 }
 0x2fc   : > { %v1390_v32 = vpop.permute.xlu0 %1389 }
 0x2fd   : > { %v1411_v44 = vmax.f32 %v1371_v14, %v1390_v32 }
 0x2fe   : > { %v1392_v33 = vpop.permute.xlu1 %1391 }
 0x2ff   : > { %v1412_v50 = vmax.f32 %v1372_v18, %v1392_v33 }
 0x300   : > { %v1394_v35 = vpop.permute.xlu0 %1393 }
 0x301   : > { %v1413_v36 = vmax.f32 %v1373_v22, %v1394_v35 }
 0x302   : > { %v1396_v37 = vpop.permute.xlu1 %1395 }
 0x303   : > { %v1414_v41 = vmax.f32 %v1374_v24, %v1396_v37  ;;  %v1418_v45 = vsub.f32 %v1409_v38, %v1413_v36 }
 0x304   : > { %v1398_v43 = vpop.permute.xlu0 %1397 }
 0x305   : > { %v1419_v46 = vsub.f32 %v1410_v39, %v1414_v41  ;;  %v1415_v47 = vmax.f32 %v1375_v26, %v1398_v43  ;;  %v1422_v54 = vand.u32 2147483647, %v1418_v45 }
 0x306   : > { %v1400_v49 = vpop.permute.xlu1 %1399 }
 0x307   : > { %v1423_v51 = vand.u32 2147483647, %v1419_v46  ;;  %v1420_v4 = vsub.f32 %v1411_v44, %v1415_v47  ;;  %v1416_v53 = vmax.f32 %v1376_v28, %v1400_v49 }
 0x309   : > { %v1421_v55 = vsub.f32 %v1412_v50, %v1416_v53  ;;  %v1430_v56 = vcombine.low %v1422_v54, %v1423_v51  ;;  %v1424_v57 = vand.u32 2147483647, %v1420_v4 }
 0x30b   : > { %v1425_v40 = vand.u32 2147483647, %v1421_v55  ;;  %v1438_v58 = vrot.slane %v1430_v56, %v1967_v62 }
 0x30d   : > { %v1431_v52 = vcombine.low %v1424_v57, %v1425_v40 }
 0x30f   : > { %v1445_v34 = vrot.slane %v1431_v52, %v1967_v62 }
 0x311   : > { %v1446_v48 = vcombine.low %v1438_v58, %v1445_v34 }
 0x313   : > { %v1453_v61 = vrot.slane %v1446_v48, %v1967_v62  ;;  %1461 = sbr.rel (%p1629_p5) target bundleno = 1006 (0x3ee), region = 48 }
 0x315   : > { %v1455_v63 = vadd.f32 %v1453_v61, %v1417_v59 }
 0x317   : > { %1457 = vst.msk [vmem:[#allocation4] sm:$0xf] %vm1456_vm7, %v1455_v63 }
 0x318   : > { %v1477_v42 = vld [vmem:[#allocation5] sm:$0xff]  ;;  %v1478_v1 = vld [vmem:[#allocation5 + $0x8] sm:$0xff]  ;;  %vm1475_vm8 = vcmask 0  }
 0x319   : > { %v1479_v3 = vsel %vm259_vm2, %v1477_v42, 0.0  ;;  %v1480_v23 = vsel %vm259_vm2, %v1478_v1, 0.0 }
 0x31a   : > { %v1481_v5 = vadd.f32 %v1480_v23, %v1479_v3 }
 0x31e   : > { %v1462_v30 = vld [vmem:[#allocation4] sm:$0xf] }
 0x31f   : > { %v1463_v2 = vsel %vm1456_vm7, %v1462_v30, 0.0 }
 0x320   : > { %1464 = vadd.xlane.f32.xlu0 %v1463_v2 }
 0x324   : > { %1482 = vadd.xlane.f32.xlu0 %v1481_v5 }
 0x3a9   : > { %v1465_v6 = vpop.xlane.xlu0 %1464 }
 0x3aa   : > { %v1466_v7 = vrot.slane %v1465_v6, 4 }
 0x3ac   : > { %v1467_v62 = vadd.f32 %v1466_v7, %v1465_v6 }
 0x3ad   : > { %v1483_v0 = vpop.xlane.xlu0 %1482 }
 0x3ae   : > { %v1468_v8 = vrot.slane %v1467_v62, 2  ;;  %v1484_v9 = vrot.slane %v1483_v0, 4 }
 0x3b0   : > { %v1485_v10 = vadd.f32 %v1484_v9, %v1483_v0  ;;  %v1469_v11 = vadd.f32 %v1468_v8, %v1467_v62 }
 0x3b2   : > { %v1486_v12 = vrot.slane %v1485_v10, 2  ;;  %v1470_v13 = vrot.slane %v1469_v11, 1 }
 0x3b4   : > { %v1487_v60 = vadd.f32 %v1486_v12, %v1485_v10  ;;  %v1471_v14 = vadd.f32 %v1470_v13, %v1469_v11 }
 0x3b6   : > { %1733 = vpush %v1471_v14  ;;  %v1488_v15 = vrot.slane %v1487_v60, 1 }
 0x3b8   : > { %v1489_v17 = vadd.f32 %v1488_v15, %v1487_v60 }
 0x3ba   : > { %1735 = vpush %v1489_v17 }
 0x3e7   : > { %s1734_s26 = spop %1733 }
 0x3e8   : > { %v1473_v18 = vstv %s1734_s26 }
 0x3e9   : > { %1476 = vst.msk [vmem:[#allocation6] sm:$0x1] %vm1475_vm8, %v1473_v18 }
 0x3eb   : > { %s1736_s8 = spop %1735 }
 0x3ec   : > { %v1491_v19 = vstv %s1736_s8 }
 0x3ed   : > { %1493 = vst.msk [vmem:[#allocation8] sm:$0x1] %vm1475_vm8, %v1491_v19 }
 0x3ee PF: > { %p1745_p6 = scmp.eq.s32.totalorder %s1897_s22, 1  ;;  %s1854_s9 = smov [#allocation6]  }
 0x3ef   : > { %s1501_s10 = sshll.u32 %s1854_s9, 4  ;;  %s1855_s11 = smov [#allocation8]   ;;  %s1502_s10 = int_to_ptr.vmem [resolvable:$true] %s1501_s10 }
 0x3f0   : > { %s1512_s12 = sshll.u32 %s1855_s11, 4  ;;  %s1785_s13 = scalar_lea.vmem %s1502_s10, 16  ;;  %s1513_s12 = int_to_ptr.vmem [resolvable:$true] %s1512_s12 }
 0x3f1   : > { %p1786_p7 = scmp.ne.s32.totalorder %s1502_s10, %s1785_s13  ;;  %s1791_s14 = scalar_lea.vmem %s1502_s10, 32 }
 0x3f2   : > { %p1792_p10 = scmp.lt.s32.totalorder %s1502_s10, %s1502_s10  ;;  %p1793_p11 = scmp.lt.s32.totalorder %s1791_s14, %s1785_s13 }
 0x3f3   : > { %p1787_p8 = pnand %p1786_p7, %p1745_p6 }
 0x3f4   : > { %p1794_p12 = por %p1793_p11, %p1792_p10 }
 0x3f5   : > { %p1788_p9 = pneg %p1787_p8 }
 0x3f7   : > { %p1795_p13 = pnand %p1794_p12, %p1788_p9 }
 0x3f9   : > { %1798 = shalt.err (!%p1795_p13)
}
 0x3fa   : > { %1738 = dma.vmem_to_hbm [thread:$0]  (%p1745_p6), %s1502_s10, 16, %s2208_s5, [#allocation7]  }
 0x3fb   : > { %s1809_s17 = scalar_lea.vmem %s1513_s12, 16  ;;  %s1815_s18 = scalar_lea.vmem %s1513_s12, 32 }
 0x3fc   : > { %p1810_p0 = scmp.ne.s32.totalorder %s1513_s12, %s1809_s17  ;;  %p1816_p3 = scmp.lt.s32.totalorder %s1513_s12, %s1513_s12 }
 0x3fd   : > { %p1817_p4 = scmp.lt.s32.totalorder %s1815_s18, %s1809_s17 }
 0x3fe   : > { %p1811_p1 = pnand %p1810_p0, %p1745_p6 }
 0x3ff   : > { %p1818_p5 = por %p1817_p4, %p1816_p3 }
 0x400   : > { %p1812_p2 = pneg %p1811_p1 }
 0x402   : > { %p1819_p7 = pnand %p1818_p5, %p1812_p2 }
 0x404   : > { %1822 = shalt.err (!%p1819_p7)
}
 0x405   : > { %1740 = dma.vmem_to_hbm [thread:$0]  (%p1745_p6), %s1513_s12, 16, %s2209_s6, [#allocation9]  }
 0x406   : > { %1838 = dma.done.wait (%p1745_p6), [#allocation7], 16  }
 0x407   : > { %1840 = vsyncadd (%p1745_p6), [#allocation7], 4294967280 }
 0x408   : > { %1842 = dma.done.wait (%p1745_p6), [#allocation9], 16  }
 0x409   : > { %1844 = vsyncadd (%p1745_p6), [#allocation9], 4294967280 }
 0x40a PF: > { %s19_s21 = sadd.s32 1, %s1847_s21  }
 0x40b   : > { %p16_p8 = scmp.ge.s32.totalorder %s19_s21, 4  }
 0x40d   :  { %18 = sbr.rel (!%p16_p8) target bundleno = 2 (0x2), region = 87 }
 0x412   :  { %1529 = vsyncpa [#allocation7], 1 }
 0x413   :  { %1531 = vsyncpa [#allocation7 + $0x1], 1 }
 0x414   :  { %1532 = vsyncpa [#allocation9], 1 }

</bundles_post_ra>
